<compile_context>
chip_gen: v6e
topology: v6e:2x2x1
jax: 0.10.0
libtpu: 0.0.40
codegen_flags: <defaults>
</compile_context>

<pallas_src>
import functools

import jax
import jax.numpy as jnp
from jax.experimental import pallas as pl
from jax.experimental.pallas import tpu as pltpu


# -----------------------------------------------------------------------------
# Kernel
# -----------------------------------------------------------------------------
def _factor_graph_kernel(x_ref, aw_ref, bc_ref, o_ref, *, factor_block, d_out):
    """One grid step == one block of `factor_block` factors.

    aw_ref block: (1, D_in, 2*fb*D_out); columns [0, fb*D_out) hold the fb
    residual matrices A_f, columns [fb*D_out, 2*fb*D_out) the weight-logit
    matrices W_f.  bc_ref holds the matching fused biases.  The f32 output
    block is resident across the (innermost, "arbitrary") factor axis.
    """
    g = pl.program_id(1)  # factor-block (reduction) axis -- innermost

    @pl.when(g == 0)
    def _():
        o_ref[...] = jnp.zeros_like(o_ref)

    x = x_ref[...]                                            # (B, D_in), bf16
    # Single wide MXU matmul for all fb factors (residuals + weight logits).
    y = jnp.dot(x, aw_ref[0], preferred_element_type=jnp.float32)
    y = y + bc_ref[0].astype(jnp.float32)                     # (B, 2*fb*D_out)

    half = factor_block * d_out
    r = y[:, :half]                                           # all residuals
    w = jax.nn.sigmoid(y[:, half:])                           # all weights (EUP)
    sq = r * r * w                                            # (B, fb*D_out), f32

    # Reduce over the factors of this block: fb 128-aligned lane-slice adds.
    acc = sq[:, :d_out]
    for i in range(1, factor_block):
        acc = acc + sq[:, i * d_out:(i + 1) * d_out]

    o_ref[...] += acc[None, :, :]


# -----------------------------------------------------------------------------
# Host-side parameter preparation (run ONCE, outside the hot path)
# -----------------------------------------------------------------------------
def _vmem_capacity_bytes():
    try:
        return int(pltpu.get_tpu_info().vmem_capacity_bytes)
    except Exception:
        return 64 << 20  # conservative fallback (v7x per-TC VMEM)


def _pick_factor_block(num_factors, d_in, d_out, itemsize, *, max_unroll=64):
    """Largest factor block whose double-buffered fused-param slab fits a
    generation-aware VMEM budget, with the epilogue unroll kept bounded."""
    cap = _vmem_capacity_bytes()
    budget = min(int(cap * 0.4), 48 << 20)      # headroom for x / out / bc
    per_factor = d_in * 2 * d_out * itemsize
    fb = max(1, budget // (2 * per_factor))     # 2 = double buffering
    return int(min(fb, num_factors, max_unroll))


def prepare_factor_graph(A, b, W, c, *, param_dtype=jnp.bfloat16,
                         factor_block=None, num_partials=None):
    """Fuse / pack / zero-pad the factor parameters once.

    A, W: (F, D_in, D_out); b, c: (F, D_out).
    Returns (aw_fused, bc_fused, meta):
      aw_fused: (num_blocks, D_in, 2*factor_block*D_out)
      bc_fused: (num_blocks, 1,    2*factor_block*D_out)
    """
    F, D_in, D_out = A.shape
    itemsize = jnp.dtype(param_dtype).itemsize

    if factor_block is None:
        factor_block = _pick_factor_block(F, D_in, D_out, itemsize)
    fb = int(factor_block)

    num_blocks = -(-F // fb)
    if num_partials is None:
        num_partials = 2 if num_blocks >= 2 else 1   # v7x: one per TensorCore
    num_partials = int(num_partials)
    num_blocks = -(-num_blocks // num_partials) * num_partials
    F_pad = num_blocks * fb

    # Zero-pad extra factors (A=0, b=0 -> residual 0 -> contributes nothing).
    if F_pad != F:
        padm = jnp.zeros((F_pad - F, D_in, D_out), A.dtype)
        padv = jnp.zeros((F_pad - F, D_out), b.dtype)
        A = jnp.concatenate([A, padm], axis=0)
        W = jnp.concatenate([W, padm], axis=0)
        b = jnp.concatenate([b, padv], axis=0)
        c = jnp.concatenate([c, padv], axis=0)

    def pack_mat(m):   # (F_pad, D_in, D_out) -> (num_blocks, D_in, fb*D_out)
        m = m.reshape(num_blocks, fb, D_in, D_out)
        m = jnp.transpose(m, (0, 2, 1, 3))
        return m.reshape(num_blocks, D_in, fb * D_out)

    def pack_vec(v):   # (F_pad, D_out) -> (num_blocks, 1, fb*D_out)
        return v.reshape(num_blocks, 1, fb * D_out)

    aw_fused = jnp.concatenate([pack_mat(A), pack_mat(W)], axis=-1)
    bc_fused = jnp.concatenate([pack_vec(b), pack_vec(c)], axis=-1)
    aw_fused = aw_fused.astype(param_dtype)
    bc_fused = bc_fused.astype(param_dtype)

    meta = dict(factor_block=fb, num_partials=num_partials,
                blocks_per_partial=num_blocks // num_partials,
                d_in=D_in, d_out=D_out, param_dtype=param_dtype)
    return aw_fused, bc_fused, meta


# -----------------------------------------------------------------------------
# Forward
# -----------------------------------------------------------------------------
def factor_graph_forward(x, aw_fused, bc_fused, meta):
    """x: (B, D_in) -> (B, D_out) = sum_f residual_f(x)^2 * weight_f(x)."""
    fb = meta["factor_block"]
    P = meta["num_partials"]
    G = meta["blocks_per_partial"]
    D_in = meta["d_in"]
    D_out = meta["d_out"]
    param_dtype = meta["param_dtype"]

    B = x.shape[0]
    x = x.astype(param_dtype)

    # Generation-aware scoped-VMEM limit sized from the chosen blocks.
    itemsize = jnp.dtype(param_dtype).itemsize
    aw_block = D_in * 2 * fb * D_out * itemsize
    bc_block = 2 * fb * D_out * itemsize
    needed = 2 * (aw_block + bc_block + B * D_in * itemsize + B * D_out * 4)
    vmem_limit = max(needed + (4 << 20), 32 << 20)
    vmem_limit = min(vmem_limit, max(_vmem_capacity_bytes() - (8 << 20), 16 << 20))

    kernel = functools.partial(_factor_graph_kernel,
                               factor_block=fb, d_out=D_out)

    partial_sums = pl.pallas_call(
        kernel,
        out_shape=jax.ShapeDtypeStruct((P, B, D_out), jnp.float32),
        grid_spec=pltpu.PrefetchScalarGridSpec(
            num_scalar_prefetch=0,
            grid=(P, G),
            in_specs=[
                # x: resident across the whole grid.
                pl.BlockSpec((B, D_in), lambda p, g: (0, 0)),
                # Fused / lane-packed [A.. | W..] parameters, one slab per step.
                pl.BlockSpec((1, D_in, 2 * fb * D_out),
                             lambda p, g: (p * G + g, 0, 0)),
                # Fused / lane-packed [b.. | c..] biases.
                pl.BlockSpec((1, 1, 2 * fb * D_out),
                             lambda p, g: (p * G + g, 0, 0)),
            ],
            # One resident f32 accumulator block per partial sum.
            out_specs=pl.BlockSpec((1, B, D_out), lambda p, g: (p, 0, 0)),
        ),
        compiler_params=pltpu.CompilerParams(
            dimension_semantics=("parallel", "arbitrary"),
            vmem_limit_bytes=int(vmem_limit),
        ),
    )(x, aw_fused, bc_fused)

    return partial_sums[0] if P == 1 else jnp.sum(partial_sums, axis=0)


def factor_graph_reference(x, A, b, W, c):
    residuals = jnp.einsum("bi,fio->fbo", x, A) + b[:, None, :]
    weights = jax.nn.sigmoid(jnp.einsum("bi,fio->fbo", x, W) + c[:, None, :])
    return jnp.sum(residuals ** 2 * weights, axis=0)


if __name__ == "__main__":
    # Small shapes: 4 factors, batch=8, in-features=32, out-features=128.
    F, B, D_in, D_out = 4, 8, 32, 128

    key = jax.random.PRNGKey(0)
    kx, ka, kb, kw, kc = jax.random.split(key, 5)
    x = jax.random.normal(kx, (B, D_in), dtype=jnp.float32)
    A = jax.random.normal(ka, (F, D_in, D_out), dtype=jnp.float32) * 0.1
    b = jax.random.normal(kb, (F, D_out), dtype=jnp.float32) * 0.1
    W = jax.random.normal(kw, (F, D_in, D_out), dtype=jnp.float32) * 0.1
    c = jax.random.normal(kc, (F, D_out), dtype=jnp.float32) * 0.1

    # One-time parameter fusion / packing (outside the hot path).
    aw_fused, bc_fused, meta = prepare_factor_graph(
        A, b, W, c, param_dtype=jnp.bfloat16)

    out = factor_graph_forward(x, aw_fused, bc_fused, meta)
    out = jax.block_until_ready(out)

    ref = factor_graph_reference(x, A, b, W, c)
    assert out.shape == (B, D_out)
    # bf16 parameter streaming (f32 accumulation) -> loosened tolerance.
    assert jnp.allclose(out, ref, atol=5e-2, rtol=5e-2), "mismatch vs reference"

    # TODO(synk): linearize()/weight() (per-factor Jacobian hstack) are not
    # part of forward() and are left to the host-side JAX wrapper.

    print("KERNEL_OK")
</pallas_src>

<mosaic_0001>
module attributes {stable_mosaic.version = 11 : i64} {
  func.func @_factor_graph_kernel(%arg0: i32, %arg1: i32, %arg2: memref<8x32xbf16, #tpu.memory_space<vmem>>, %arg3: memref<1x32x1024xbf16, #tpu.memory_space<vmem>>, %arg4: memref<1x1x1024xbf16, #tpu.memory_space<vmem>>, %arg5: memref<1x8x128xf32, #tpu.memory_space<vmem>>) attributes {dimension_semantics = [#tpu.dimension_semantics<parallel>, #tpu.dimension_semantics<arbitrary>], iteration_bounds = array<i64: 1, 1>, scalar_prefetch = 0 : i64, scratch_operands = 0 : i64, tpu.core_type = #tpu.core_type<tc>, window_params = [{pipeline_mode = #tpu.pipeline_mode<synchronous>, transform_indices = @transform_0, window_bounds = array<i64: 8, 32>}, {transform_indices = @transform_1, window_bounds = array<i64: 1, 32, 1024>}, {transform_indices = @transform_2, window_bounds = array<i64: 1, 1, 1024>}, {transform_indices = @transform_3, window_bounds = array<i64: 1, 8, 128>}]} {
    %c0_i32 = arith.constant 0 : i32
    %0 = arith.cmpi eq, %arg1, %c0_i32 : i32
    %1 = arith.extui %0 : i1 to i32
    %c0_i32_0 = arith.constant 0 : i32
    %2 = arith.cmpi ne, %1, %c0_i32_0 : i32
    scf.if %2 {
      %cst_15 = arith.constant 0.000000e+00 : f32
      %32 = vector.broadcast %cst_15 : f32 to vector<1x8x128xf32>
      %c0_16 = arith.constant 0 : index
      %c0_17 = arith.constant 0 : index
      %c0_18 = arith.constant 0 : index
      %33 = vector.load %arg5[%c0_16, %c0_17, %c0_18] : memref<1x8x128xf32, #tpu.memory_space<vmem>>, vector<1x8x128xf32>
      tpu.vector_store %arg5[%c0_16, %c0_17, %c0_18], %32 {strides = array<i32>} : memref<1x8x128xf32, #tpu.memory_space<vmem>>, vector<1x8x128xf32>,
    } else {
    }
    %c0 = arith.constant 0 : index
    %c0_1 = arith.constant 0 : index
    %3 = vector.load %arg2[%c0, %c0_1] : memref<8x32xbf16, #tpu.memory_space<vmem>>, vector<8x32xbf16>
    %c0_2 = arith.constant 0 : index
    %c0_3 = arith.constant 0 : index
    %c0_4 = arith.constant 0 : index
    %4 = vector.load %arg3[%c0_2, %c0_3, %c0_4] : memref<1x32x1024xbf16, #tpu.memory_space<vmem>>, vector<1x32x1024xbf16>
    %5 = vector.shape_cast %4 : vector<1x32x1024xbf16> to vector<32x1024xbf16>
    %cst = arith.constant dense<0.000000e+00> : vector<8x1024xf32>
    %6 = tpu.matmul %3, %5, %cst {dimension_numbers = #tpu.dot_dimension_numbers<[1], [0], [0], [1], [0, 0, 1, 1], [], []>} : vector<8x32xbf16>, vector<32x1024xbf16>, vector<8x1024xf32> -> vector<8x1024xf32>
    %c0_5 = arith.constant 0 : index
    %c0_6 = arith.constant 0 : index
    %c0_7 = arith.constant 0 : index
    %7 = vector.load %arg4[%c0_5, %c0_6, %c0_7] : memref<1x1x1024xbf16, #tpu.memory_space<vmem>>, vector<1x1x1024xbf16>
    %8 = vector.shape_cast %7 : vector<1x1x1024xbf16> to vector<1x1024xbf16>
    %9 = arith.extf %8 : vector<1x1024xbf16> to vector<1x1024xf32>
    %10 = vector.broadcast %9 : vector<1x1024xf32> to vector<8x1024xf32>
    %11 = arith.addf %6, %10 : vector<8x1024xf32>
    %12 = vector.extract_strided_slice %11 {offsets = [0, 0], sizes = [8, 512], strides = [1, 1]} : vector<8x1024xf32> to vector<8x512xf32>
    %13 = vector.extract_strided_slice %11 {offsets = [0, 512], sizes = [8, 512], strides = [1, 1]} : vector<8x1024xf32> to vector<8x512xf32>
    %14 = arith.negf %13 : vector<8x512xf32>
    %15 = math.exp %14 : vector<8x512xf32>
    %cst_8 = arith.constant 1.000000e+00 : f32
    %16 = vector.broadcast %cst_8 : f32 to vector<8x512xf32>
    %17 = arith.addf %16, %15 : vector<8x512xf32>
    %18 = arith.divf %16, %17 : vector<8x512xf32>
    %19 = arith.mulf %12, %12 : vector<8x512xf32>
    %20 = arith.mulf %19, %18 : vector<8x512xf32>
    %21 = vector.extract_strided_slice %20 {offsets = [0, 0], sizes = [8, 128], strides = [1, 1]} : vector<8x512xf32> to vector<8x128xf32>
    %22 = vector.extract_strided_slice %20 {offsets = [0, 128], sizes = [8, 128], strides = [1, 1]} : vector<8x512xf32> to vector<8x128xf32>
    %23 = arith.addf %21, %22 : vector<8x128xf32>
    %24 = vector.extract_strided_slice %20 {offsets = [0, 256], sizes = [8, 128], strides = [1, 1]} : vector<8x512xf32> to vector<8x128xf32>
    %25 = arith.addf %23, %24 : vector<8x128xf32>
    %26 = vector.extract_strided_slice %20 {offsets = [0, 384], sizes = [8, 128], strides = [1, 1]} : vector<8x512xf32> to vector<8x128xf32>
    %27 = arith.addf %25, %26 : vector<8x128xf32>
    %c0_9 = arith.constant 0 : index
    %c0_10 = arith.constant 0 : index
    %c0_11 = arith.constant 0 : index
    %28 = vector.load %arg5[%c0_9, %c0_10, %c0_11] : memref<1x8x128xf32, #tpu.memory_space<vmem>>, vector<1x8x128xf32>
    %29 = vector.shape_cast %27 : vector<8x128xf32> to vector<1x8x128xf32>
    %30 = arith.addf %28, %29 : vector<1x8x128xf32>
    %c0_12 = arith.constant 0 : index
    %c0_13 = arith.constant 0 : index
    %c0_14 = arith.constant 0 : index
    %31 = vector.load %arg5[%c0_12, %c0_13, %c0_14] : memref<1x8x128xf32, #tpu.memory_space<vmem>>, vector<1x8x128xf32>
    tpu.vector_store %arg5[%c0_12, %c0_13, %c0_14], %30 {strides = array<i32>} : memref<1x8x128xf32, #tpu.memory_space<vmem>>, vector<1x8x128xf32>,
    return
  }
  func.func @transform_0(%arg0: i32, %arg1: i32) -> (i32, i32) {
    %c0_i32 = arith.constant 0 : i32
    %c0_i32_0 = arith.constant 0 : i32
    %c0_i32_1 = arith.constant 0 : i32
    return %c0_i32, %c0_i32_0 : i32, i32
  }
  func.func @transform_1(%arg0: i32, %arg1: i32) -> (i32, i32, i32) {
    %c1_i32 = arith.constant 1 : i32
    %0 = arith.muli %arg0, %c1_i32 : i32
    %1 = arith.addi %0, %arg1 : i32
    %c0_i32 = arith.constant 0 : i32
    %c0_i32_0 = arith.constant 0 : i32
    %c0_i32_1 = arith.constant 0 : i32
    return %1, %c0_i32, %c0_i32_0 : i32, i32, i32
  }
  func.func @transform_2(%arg0: i32, %arg1: i32) -> (i32, i32, i32) {
    %c1_i32 = arith.constant 1 : i32
    %0 = arith.muli %arg0, %c1_i32 : i32
    %1 = arith.addi %0, %arg1 : i32
    %c0_i32 = arith.constant 0 : i32
    %c0_i32_0 = arith.constant 0 : i32
    %c0_i32_1 = arith.constant 0 : i32
    return %1, %c0_i32, %c0_i32_0 : i32, i32, i32
  }
  func.func @transform_3(%arg0: i32, %arg1: i32) -> (i32, i32, i32) {
    %c0_i32 = arith.constant 0 : i32
    %c0_i32_0 = arith.constant 0 : i32
    %c0_i32_1 = arith.constant 0 : i32
    return %arg0, %c0_i32, %c0_i32_0 : i32, i32, i32
  }
}

</mosaic_0001>

<bundles_post_ra>
// kernel: tpu_custom_call.1
= control target key start
LH: loop header
LB: loop body
LE: loop exit
PB: predicated region body
PF: predicated region fallthrough
CT: control target
= control target key end

     0   :  { %8 = vsyncpa [#allocation3], 0  ;;  %s653_s0 = inlined_call_operand.hbm [shape: bf16[8,32], index: 0, kind: input, shape index: {}]   ;;  %s654_s1 = inlined_call_operand.hbm [shape: bf16[1,32,1024], index: 1, kind: input, shape index: {}]   ;;  %s655_s2 = inlined_call_operand.hbm [shape: bf16[1,1,1024], index: 2, kind: input, shape index: {}]   ;;  %s656_s3 = inlined_call_operand.hbm [shape: f32[1,8,128], index: 3, kind: output, shape index: {}]  }
   0x1   :  { %9 = vsyncpa [#allocation6], 0 }
   0x2   :  { %10 = vsyncpa [#allocation4], 0  ;;  %s598_s12 = smov [#allocation5]  }
   0x3   :  { %s30_s13 = sshll.u32 %s598_s12, 4  ;;  %s31_s13 = int_to_ptr.vmem [resolvable:$true] %s30_s13 }
   0x4   :  { %s520_s14 = scalar_lea.vmem %s31_s13, 2048  ;;  %p525_p1 = scmp.lt.s32.totalorder %s31_s13, %s31_s13 }
   0x5   :  { %p521_p0 = scmp.ne.s32.totalorder %s31_s13, %s520_s14  ;;  %p526_p2 = scmp.lt.s32.totalorder %s520_s14, %s520_s14 }
   0x7   :  { %p527_p3 = por %p526_p2, %p525_p1 }
   0x9   :  { %p528_p4 = pnand %p527_p3, %p521_p0 }
   0xb   :  { %531 = shalt.err (!%p528_p4)
}
   0xc   :  { %s599_s15 = smov 512   ;;  %s600_s16 = smov 32  }
   0xd   :  { %36 = dma.hbm_to_vmem [thread:$0]  %s654_s1, 2048, %s31_s13, [#allocation6], %s599_s15, %s599_s15, %s600_s16  }
   0xe   :  { %s601_s19 = smov [#allocation2]   ;;  %s602_s21 = smov [#allocation7]  }
   0xf   :  { %s17_s20 = sshll.u32 %s601_s19, 4  ;;  %s47_s22 = sshll.u32 %s602_s21, 4  ;;  %s18_s20 = int_to_ptr.vmem [resolvable:$true] %s17_s20  ;;  %s48_s22 = int_to_ptr.vmem [resolvable:$true] %s47_s22 }
  0x10   :  { %s540_s23 = scalar_lea.vmem %s18_s20, 64  ;;  %p545_p6 = scmp.lt.s32.totalorder %s18_s20, %s18_s20 }
  0x11   :  { %p541_p5 = scmp.ne.s32.totalorder %s18_s20, %s540_s23  ;;  %p546_p7 = scmp.lt.s32.totalorder %s540_s23, %s540_s23 }
  0x13   :  { %p547_p8 = por %p546_p7, %p545_p6 }
  0x15   :  { %p548_p9 = pnand %p547_p8, %p541_p5 }
  0x17   :  { %551 = shalt.err (!%p548_p9)
}
  0x18   :  { %20 = dma.hbm_to_vmem [thread:$0]  %s653_s0, 64, %s18_s20, [#allocation3]  }
  0x19   :  { %s560_s26 = scalar_lea.vmem %s48_s22, 128  ;;  %p565_p11 = scmp.lt.s32.totalorder %s48_s22, %s48_s22 }
  0x1a   :  { %p561_p10 = scmp.ne.s32.totalorder %s48_s22, %s560_s26  ;;  %p566_p12 = scmp.lt.s32.totalorder %s560_s26, %s560_s26 }
  0x1c   :  { %p567_p13 = por %p566_p12, %p565_p11 }
  0x1e   :  { %p568_p0 = pnand %p567_p13, %p561_p10 }
  0x20   :  { %571 = shalt.err (!%p568_p0)
}
  0x21   :  { %50 = dma.hbm_to_vmem [thread:$0]  %s655_s2, 128, %s48_s22, [#allocation6]  }
  0x22   :  { %592 = dma.done.wait [#allocation3], 64  }
  0x23   :  { %593 = vsyncadd [#allocation3], 4294967232 }
  0x24   :  { %594 = dma.done.wait [#allocation6], 2176  }
  0x25   :  { %595 = vsyncadd [#allocation6], 4294965120  ;;  %v603_v0 = vmov 0   ;;  %v77_v1 = vld [vmem:[#allocation5 + $0x40] sm:$0xff]  ;;  %v78_v3 = vld [vmem:[#allocation5 + $0x48] sm:$0xff]  ;;  %vm242_vm0 = vcmask 261120   ;;  %v90_v34 = vlaneseq }
  0x26   :  { %278 = vmatprep.mubr.bf16.mxu0 %v603_v0  ;;  %319 = vmatprep.mubr.bf16.mxu1 %v603_v0  ;;  %v81_v2 = vld [vmem:[#allocation5 + $0x60] sm:$0xff]  ;;  %v82_v5 = vld [vmem:[#allocation5 + $0x68] sm:$0xff]  ;;  %v79_v15 = vld [vmem:[#allocation5 + $0x50] sm:$0xff]  ;;  %s604_s0 = smov [#allocation8]  }
  0x27   :  { %v473_v4 = vcombine.high %v77_v1, %v81_v2  ;;  %v472_v6 = vcombine.low %v77_v1, %v81_v2  ;;  %v69_v7 = vld [vmem:[#allocation5] sm:$0xff]  ;;  %v475_v9 = vcombine.high %v78_v3, %v82_v5  ;;  %v474_v10 = vcombine.low %v78_v3, %v82_v5  ;;  %v70_v12 = vld [vmem:[#allocation5 + $0x8] sm:$0xff]  ;;  %v83_v16 = vld [vmem:[#allocation5 + $0x70] sm:$0xff]  ;;  %s454_s2 = sshll.u32 %s604_s0, 4  ;;  %s455_s2 = int_to_ptr.vmem [resolvable:$true] %s454_s2 }
  0x28   :  { %v73_v8 = vld [vmem:[#allocation5 + $0x20] sm:$0xff]  ;;  %v74_v13 = vld [vmem:[#allocation5 + $0x28] sm:$0xff]  ;;  %v80_v17 = vld [vmem:[#allocation5 + $0x58] sm:$0xff]  ;;  %v477_v21 = vcombine.high %v79_v15, %v83_v16  ;;  %v476_v28 = vcombine.low %v79_v15, %v83_v16  ;;  %v91_v35 = vshrl.u32 %v90_v34, 7  ;;  %s572_s28 = scalar_lea.vmem %s455_s2, 128  ;;  %p577_p2 = scmp.lt.s32.totalorder %s455_s2, %s455_s2 }
  0x29   :  { %v465_v11 = vcombine.high %v69_v7, %v73_v8  ;;  %258 = vmatprep.subr.bf16.mxu0 %v473_v4  ;;  %v467_v14 = vcombine.high %v70_v12, %v74_v13  ;;  %299 = vmatprep.subr.bf16.mxu1 %v475_v9  ;;  %v464_v18 = vcombine.low %v69_v7, %v73_v8  ;;  %v84_v19 = vld [vmem:[#allocation5 + $0x78] sm:$0xff]  ;;  %v71_v23 = vld [vmem:[#allocation5 + $0x10] sm:$0xff]  ;;  %v85_v36 = vld [vmem:[#allocation7] sm:$0xff]  ;;  %p573_p1 = scmp.ne.s32.totalorder %s455_s2, %s572_s28  ;;  %p578_p3 = scmp.lt.s32.totalorder %s572_s28, %s572_s28 }
  0x2a   :  { %259 = vmatpush1.bf16.msra.mxu0 %v472_v6  ;;  %300 = vmatpush1.bf16.msra.mxu1 %v474_v10  ;;  %v466_v20 = vcombine.low %v70_v12, %v74_v13  ;;  %v479_v22 = vcombine.high %v80_v17, %v84_v19  ;;  %v75_v24 = vld [vmem:[#allocation5 + $0x30] sm:$0xff]  ;;  %v72_v25 = vld [vmem:[#allocation5 + $0x18] sm:$0xff]  ;;  %v478_v29 = vcombine.low %v80_v17, %v84_v19  ;;  %v87_v37 = vunpack.c.h.bf16 %v85_v36 }
  0x2b   :  { %260 = vmatprep.subr.bf16.mxu0 %v465_v11  ;;  %301 = vmatprep.subr.bf16.mxu1 %v467_v14  ;;  %v76_v26 = vld [vmem:[#allocation5 + $0x38] sm:$0xff]  ;;  %v469_v30 = vcombine.high %v71_v23, %v75_v24  ;;  %v468_v32 = vcombine.low %v71_v23, %v75_v24  ;;  %v638_v38 = vsub.s32 0, %v91_v35  ;;  %v100_v40 = vsub.s32 4, %v91_v35  ;;  %p579_p4 = por %p578_p3, %p577_p2 }
  0x2c   :  { %v68_v27 = vld [vmem:[#allocation2] sm:$0xf]  ;;  %v471_v31 = vcombine.high %v72_v25, %v76_v26  ;;  %v470_v33 = vcombine.low %v72_v25, %v76_v26  ;;  %v96_v42 = vsub.s32 2, %v91_v35  ;;  %v104_v45 = vsub.s32 6, %v91_v35 }
  0x2d   :  { %v109_v43 = vrot.slane %v87_v37, %v638_v38  ;;  %v117_v46 = vrot.slane %v87_v37, %v100_v40  ;;  %v86_v12 = vunpack.c.l.bf16 %v85_v36  ;;  %p580_p5 = pnand %p579_p4, %p573_p1 }
  0x2e   :  { %261 = vmatpush1.bf16.msra.mxu0 %v464_v18  ;;  %302 = vmatpush1.bf16.msra.mxu1 %v466_v20  ;;  %v113_v48 = vrot.slane %v87_v37, %v96_v42  ;;  %v121_v50 = vrot.slane %v87_v37, %v104_v45 }
  0x2f   :  { %340 = vmatprep.subr.bf16.mxu0 %v477_v21  ;;  %381 = vmatprep.subr.bf16.mxu1 %v479_v22  ;;  %v149_v52 = vrot.slane %v109_v43, %v638_v38  ;;  %v157_v54 = vrot.slane %v117_v46, %v638_v38  ;;  %v93_v19 = vrot.slane %v86_v12, %v638_v38 }
  0x30   :  { %v153_v56 = vrot.slane %v113_v48, %v638_v38  ;;  %v161_v58 = vrot.slane %v121_v50, %v638_v38  ;;  %v97_v20 = vrot.slane %v86_v12, %v96_v42  ;;  %v101_v21 = vrot.slane %v86_v12, %v100_v40 }
  0x31   :  { %480 = vmatmul.mubr.msk.bf16.vlgmr.msra.gmra.mxu0 %vm242_vm0, %v68_v27  ;;  %481 = vmatmul.mubr.msk.bf16.vlgmr.msra.gmra.mxu1 %vm242_vm0, %v68_v27  ;;  %v133_v22 = vrot.slane %v93_v19, %v638_v38  ;;  %v105_v24 = vrot.slane %v86_v12, %v104_v45 }
  0x32   :  { %341 = vmatpush1.bf16.msra.mxu0 %v476_v28  ;;  %382 = vmatpush1.bf16.msra.mxu1 %v478_v29  ;;  %v137_v23 = vrot.slane %v97_v20, %v638_v38  ;;  %v141_v25 = vrot.slane %v101_v21, %v638_v38 }
  0x33   :  { %342 = vmatprep.subr.bf16.mxu0 %v469_v30  ;;  %383 = vmatprep.subr.bf16.mxu1 %v471_v31  ;;  %v145_v28 = vrot.slane %v105_v24, %v638_v38 }
  0x34   :  { %360 = vmatprep.mubr.bf16.mxu0 %v603_v0  ;;  %401 = vmatprep.mubr.bf16.mxu1 %v603_v0 }
  0x36   :  { %343 = vmatpush1.bf16.msra.mxu0 %v468_v32  ;;  %384 = vmatpush1.bf16.msra.mxu1 %v470_v33 }
  0x39   :  { %482 = vmatmul.mubr.msk.bf16.vlgmr.msra.gmra.mxu0 %vm242_vm0, %v68_v27  ;;  %483 = vmatmul.mubr.msk.bf16.vlgmr.msra.gmra.mxu1 %vm242_vm0, %v68_v27 }
  0xf1   :  { %v280_v39 = vpop.f32.mrf.mxu0  ;;  %v321_v41 = vpop.f32.mrf.mxu1 }
  0xf2   :  { %v281_v26 = vadd.f32 %v280_v39, %v133_v22  ;;  %v322_v29 = vadd.f32 %v321_v41, %v141_v25 }
  0xf3   :  { %v282_v44 = vpop.f32.mrf.mxu0  ;;  %v323_v47 = vpop.f32.mrf.mxu1 }
  0xf4   :  { %v283_v27 = vadd.f32 %v282_v44, %v137_v23  ;;  %v434_v32 = vmul.f32 %v281_v26, %v281_v26  ;;  %v324_v34 = vadd.f32 %v323_v47, %v145_v28  ;;  %v436_v36 = vmul.f32 %v322_v29, %v322_v29 }
  0xf5   :  { %v284_v49 = vpop.f32.mrf.mxu0  ;;  %v325_v51 = vpop.f32.mrf.mxu1 }
  0xf6   :  { %v435_v33 = vmul.f32 %v283_v27, %v283_v27  ;;  %v437_v43 = vmul.f32 %v324_v34, %v324_v34 }
  0xf7   :  { %v285_v53 = vpop.f32.mrf.mxu0  ;;  %v326_v55 = vpop.f32.mrf.mxu1 }
  0xf9   :  { %v362_v57 = vpop.f32.mrf.mxu0  ;;  %v403_v60 = vpop.f32.mrf.mxu1 }
  0xfa   :  { %v363_v59 = vadd.f32 %v362_v57, %v149_v52  ;;  %v404_v61 = vadd.f32 %v403_v60, %v157_v54 }
  0xfb   :  { %v364_v62 = vpop.f32.mrf.mxu0  ;;  %v405_v1 = vpop.f32.mrf.mxu1 }
  0xfc   :  { %v484_v63 = vmul.f32 -1.442695, %v363_v59  ;;  %v365_v0 = vadd.f32 %v364_v62, %v153_v56  ;;  %v486_v2 = vmul.f32 -1.442695, %v404_v61  ;;  %v406_v3 = vadd.f32 %v405_v1, %v161_v58 }
  0xfd   :  { %v366_v4 = vpop.f32.mrf.mxu0  ;;  %v407_v6 = vpop.f32.mrf.mxu1 }
  0xfe   :  { %496 = vpow2.f32 %v484_v63  ;;  %v485_v5 = vmul.f32 -1.442695, %v365_v0  ;;  %v487_v7 = vmul.f32 -1.442695, %v406_v3 }
  0xff   :  { %498 = vpow2.f32 %v486_v2  ;;  %v367_v8 = vpop.f32.mrf.mxu0  ;;  %v408_v9 = vpop.f32.mrf.mxu1 }
 0x100   :  { %500 = vpow2.f32 %v485_v5 }
 0x101   :  { %502 = vpow2.f32 %v487_v7 }
 0x10b   :  { %v497_v10 = vpop.eup %496 }
 0x10c   :  { %v499_v11 = vpop.eup %498  ;;  %v422_v13 = vadd.f32 1.0, %v497_v10 }
 0x10d   :  { %v501_v14 = vpop.eup %500  ;;  %v424_v15 = vadd.f32 1.0, %v499_v11 }
 0x10e   :  { %v503_v16 = vpop.eup %502  ;;  %504 = vrcp.f32 %v422_v13  ;;  %v423_v17 = vadd.f32 1.0, %v501_v14 }
 0x10f   :  { %506 = vrcp.f32 %v424_v15  ;;  %v425_v18 = vadd.f32 1.0, %v503_v16 }
 0x110   :  { %508 = vrcp.f32 %v423_v17 }
 0x111   :  { %510 = vrcp.f32 %v425_v18 }
 0x11b   :  { %v505_v30 = vpop.eup %504 }
 0x11c   :  { %v507_v31 = vpop.eup %506  ;;  %v438_v37 = vmul.f32 %v505_v30, %v434_v32 }
 0x11d   :  { %v509_v35 = vpop.eup %508  ;;  %v440_v46 = vmul.f32 %v507_v31, %v436_v36 }
 0x11e   :  { %v439_v40 = vmul.f32 %v509_v35, %v435_v33  ;;  %v511_v42 = vpop.eup %510 }
 0x11f   :  { %v441_v48 = vmul.f32 %v511_v42, %v437_v43 }
 0x120   :  { %v442_v45 = vadd.f32 %v439_v40, %v438_v37 }
 0x122   :  { %v443_v49 = vadd.f32 %v442_v45, %v440_v46 }
 0x124   :  { %v444_v39 = vadd.f32 %v443_v49, %v441_v48 }
 0x126   :  { %447 = vst [vmem:[#allocation8] sm:$0xff] %v444_v39 }
 0x127   :  { %583 = shalt.err (!%p580_p5)
}
 0x128   :  { %457 = dma.vmem_to_hbm [thread:$0]  %s455_s2, 128, %s656_s3, [#allocation4]  }
 0x129   :  { %596 = dma.done.wait [#allocation4], 128  }
 0x12a   :  { %597 = vsyncadd [#allocation4], 4294967168 }
 0x12b   :  { %461 = vsyncpa [#allocation3], 1 }
 0x12c   :  { %462 = vsyncpa [#allocation6], 1 }
 0x12d   :  { %463 = vsyncpa [#allocation4], 1 }

</bundles_post_ra>
